<compile_context>
chip_gen: v5e
topology: v5e:2x2
jax: 0.10.0
libtpu: 0.0.40
codegen_flags: <defaults>
</compile_context>

<pallas_src>
import functools

import jax
import jax.numpy as jnp
from jax.experimental import pallas as pl
from jax.experimental.pallas import tpu as pltpu


def _mha_kernel(q_ref, k_ref, v_ref, wq_ref, wk_ref, wv_ref, g_ref, b_ref,
                out_ref, *rest, n_head, d_k, d_v, eps, has_attn):
    """One grid step == one (batch-tile, Lq-tile); all refs live in VMEM."""
    if has_attn:
        attn_ref = rest[0]
        qp_ref, kp_ref, vp_ref, ctx_ref = rest[1:]
    else:
        attn_ref = None
        qp_ref, kp_ref, vp_ref, ctx_ref = rest

    bt, tq, d_model = q_ref.shape
    _, lk, _ = k_ref.shape
    _, lv, _ = v_ref.shape
    act_dt = qp_ref.dtype

    inv_temp = 1.0 / (float(d_k) ** 0.5)          # folded once into q_p

    # ---- fused (all-heads) projections: one wide-N MXU matmul per input ----
    q2 = q_ref[...].reshape(bt * tq, d_model)
    k2 = k_ref[...].reshape(bt * lk, d_model)
    v2 = v_ref[...].reshape(bt * lv, d_model)

    qp = jnp.dot(q2, wq_ref[...], preferred_element_type=jnp.float32) * inv_temp
    qp_ref[...] = qp.astype(act_dt).reshape(bt, tq, n_head * d_k)
    kp = jnp.dot(k2, wk_ref[...], preferred_element_type=jnp.float32)
    kp_ref[...] = kp.astype(act_dt).reshape(bt, lk, n_head * d_k)
    vp = jnp.dot(v2, wv_ref[...], preferred_element_type=jnp.float32)
    vp_ref[...] = vp.astype(act_dt).reshape(bt, lv, n_head * d_v)

    # ---- per-head attention; per-head reads are static REF slices ----------
    for h in range(n_head):                        # static unroll over heads
        qh = qp_ref[:, :, h * d_k:(h + 1) * d_k]   # (bt, tq, d_k)
        kh = kp_ref[:, :, h * d_k:(h + 1) * d_k]   # (bt, lk, d_k)
        vh = vp_ref[:, :, h * d_v:(h + 1) * d_v]   # (bt, lv, d_v)

        # Contract d_k directly (no materialized k transpose).
        scores = jnp.einsum('bqd,bkd->bqk', qh, kh,
                            preferred_element_type=jnp.float32)  # (bt,tq,lk)
        smax = jnp.max(scores, axis=-1, keepdims=True)
        p = jnp.exp(scores - smax)
        denom = jnp.sum(p, axis=-1, keepdims=True)

        # attn @ V with unnormalized probs; normalize the SMALL (tq, d_v)
        # context afterwards with the EUP approximate reciprocal.
        ctx = jnp.einsum('bqk,bkd->bqd', p.astype(act_dt), vh,
                         preferred_element_type=jnp.float32)     # (bt,tq,d_v)
        ctx_ref[:, :, h * d_v:(h + 1) * d_v] = (
            ctx * pl.reciprocal(denom, approx=True))

        if attn_ref is not None:
            # Returned probabilities use an EXACT divide (safe for downstream
            # consumers such as losses / distillation).
            attn_ref[:, h] = (p / denom).astype(attn_ref.dtype)

    # ---- residual + LayerNorm in f32; q re-read so it is not live across
    # ---- the unrolled head loop.
    x = ctx_ref[...] + q_ref[...].astype(jnp.float32)
    mean = jnp.mean(x, axis=-1, keepdims=True)
    var = jnp.mean(jnp.square(x - mean), axis=-1, keepdims=True)
    y = (x - mean) * jax.lax.rsqrt(var + eps)
    y = (y * g_ref[0][None, None, :].astype(jnp.float32)
         + b_ref[0][None, None, :].astype(jnp.float32))
    out_ref[...] = y.astype(out_ref.dtype)


def _divisors_desc(n):
    return [d for d in range(n, 0, -1) if n % d == 0]


def _vmem_capacity_bytes():
    try:
        info = pltpu.get_tpu_info()
        return int(getattr(info, "vmem_capacity_bytes", 128 << 20))
    except Exception:
        return 128 << 20


def multi_head_attention(q, k, v, wq_t, wk_t, wv_t, gamma, beta, *,
                         n_head, d_k, d_v, eps=1e-5,
                         return_attn=False, attn_dtype=jnp.bfloat16,
                         compute_dtype=None, batch_tile=None, q_tile=None):
    """q,k,v: [B, L, d_model]; wq_t/wk_t/wv_t: [d_model, n_head*d{k,v}] (W.T)."""
    B, Lq, d_model = q.shape
    _, Lk, _ = k.shape
    _, Lv, _ = v.shape
    assert n_head * d_v == d_model, "residual add requires n_head*d_v == d_model"
    assert Lk == Lv, "len_k must equal len_v"

    out_dtype = q.dtype
    if compute_dtype is not None:                  # e.g. bf16 on v6e / v7x
        q, k, v = (x.astype(compute_dtype) for x in (q, k, v))
        wq_t, wk_t, wv_t = (w.astype(compute_dtype) for w in (wq_t, wk_t, wv_t))
    act_dtype = q.dtype
    act_bytes = jnp.dtype(act_dtype).itemsize
    out_bytes = jnp.dtype(out_dtype).itemsize
    attn_bytes = jnp.dtype(attn_dtype).itemsize if return_attn else 0

    gamma2 = gamma.reshape(1, d_model)
    beta2 = beta.reshape(1, d_model)
    w_bytes = (wq_t.size + wk_t.size + wv_t.size) * jnp.dtype(wq_t.dtype).itemsize

    # -------- honest VMEM accounting: DMA blocks (x2 for double-buffering),
    # -------- f32/act intermediates, live scores/probs, weights.
    def vmem_estimate(bt, tq):
        dma = bt * (tq + Lk + Lv) * d_model * act_bytes        # q,k,v blocks
        dma += bt * tq * d_model * out_bytes                    # out block
        dma += bt * n_head * tq * Lk * attn_bytes               # attn block
        scratch = bt * (tq + Lk) * n_head * d_k * act_bytes     # qp, kp
        scratch += bt * Lv * n_head * d_v * act_bytes           # vp
        scratch += bt * tq * n_head * d_v * 4                   # ctx (f32)
        live = 2 * bt * tq * Lk * 4                             # scores + probs
        live += 2 * bt * tq * d_model * 4                       # x, y (f32)
        return 2 * dma + scratch + live + 2 * w_bytes + (1 << 20)

    vmem_cap = _vmem_capacity_bytes()              # 64 MiB on v7x, 128 on v5e/v6e
    vmem_budget = (vmem_cap * 3) // 4              # headroom for Mosaic scratch

    def pick_tiles():
        # Prefer >= 2 batch tiles (keeps both v7x TensorCores busy) and a full
        # Lq tile; shrink tq only when the VMEM budget forces it.
        bt_cands = [d for d in _divisors_desc(B) if B == 1 or d <= max(1, B // 2)]
        bt_cands = bt_cands or [1]
        for tq in _divisors_desc(Lq):
            for bt in bt_cands:
                if vmem_estimate(bt, tq) <= vmem_budget:
                    return bt, tq
        return 1, 1

    if batch_tile is not None or q_tile is not None:
        bt = batch_tile if batch_tile is not None else B
        tq = q_tile if q_tile is not None else Lq
        assert B % bt == 0 and Lq % tq == 0, "tiles must divide B and Lq"
    else:
        bt, tq = pick_tiles()

    vmem_limit = int(min(vmem_budget, max(vmem_estimate(bt, tq), 32 << 20)))
    grid = (B // bt, Lq // tq)

    kernel = functools.partial(_mha_kernel, n_head=n_head, d_k=d_k, d_v=d_v,
                               eps=eps, has_attn=return_attn)

    in_specs = [
        pl.BlockSpec((bt, tq, d_model), lambda b, qi: (b, qi, 0)),
        pl.BlockSpec((bt, Lk, d_model), lambda b, qi: (b, 0, 0)),
        pl.BlockSpec((bt, Lv, d_model), lambda b, qi: (b, 0, 0)),
        pl.BlockSpec((d_model, n_head * d_k), lambda b, qi: (0, 0)),
        pl.BlockSpec((d_model, n_head * d_k), lambda b, qi: (0, 0)),
        pl.BlockSpec((d_model, n_head * d_v), lambda b, qi: (0, 0)),
        pl.BlockSpec((1, d_model), lambda b, qi: (0, 0)),
        pl.BlockSpec((1, d_model), lambda b, qi: (0, 0)),
    ]
    out_shapes = [jax.ShapeDtypeStruct((B, Lq, d_model), out_dtype)]
    out_specs = [pl.BlockSpec((bt, tq, d_model), lambda b, qi: (b, qi, 0))]
    if return_attn:
        out_shapes.append(jax.ShapeDtypeStruct((B, n_head, Lq, Lk), attn_dtype))
        out_specs.append(pl.BlockSpec((bt, n_head, tq, Lk),
                                      lambda b, qi: (b, 0, qi, 0)))

    scratch_shapes = [
        pltpu.VMEM((bt, tq, n_head * d_k), act_dtype),    # qp
        pltpu.VMEM((bt, Lk, n_head * d_k), act_dtype),    # kp
        pltpu.VMEM((bt, Lv, n_head * d_v), act_dtype),    # vp
        pltpu.VMEM((bt, tq, n_head * d_v), jnp.float32),  # per-head context
    ]

    if return_attn:
        out_shape, out_spec = tuple(out_shapes), tuple(out_specs)
    else:
        out_shape, out_spec = out_shapes[0], out_specs[0]

    return pl.pallas_call(
        kernel,
        out_shape=out_shape,
        grid_spec=pltpu.PrefetchScalarGridSpec(
            num_scalar_prefetch=0,
            grid=grid,
            in_specs=in_specs,
            out_specs=out_spec,
            scratch_shapes=scratch_shapes,
        ),
        compiler_params=pltpu.CompilerParams(
            dimension_semantics=("parallel", "parallel"),
            vmem_limit_bytes=vmem_limit,
        ),
    )(q, k, v, wq_t, wk_t, wv_t, gamma2, beta2)


if __name__ == "__main__":
    # Small config consistent with the module: n_head*d_v == d_model (residual).
    n_head, d_model, d_k, d_v = 4, 32, 8, 8
    B, L = 2, 8

    key = jax.random.PRNGKey(0)
    k_q, k_k, k_v, k_wq, k_wk, k_wv = jax.random.split(key, 6)

    q = jax.random.normal(k_q, (B, L, d_model), dtype=jnp.float32)
    k = jax.random.normal(k_k, (B, L, d_model), dtype=jnp.float32)
    v = jax.random.normal(k_v, (B, L, d_model), dtype=jnp.float32)

    # Deterministic parameter init matching the module's __init__ distributions.
    std_qk = (2.0 / (d_model + d_k)) ** 0.5
    std_v = (2.0 / (d_model + d_v)) ** 0.5
    # nn.Linear weight is [out, in]; kernel consumes W.T == [in, out].
    wq_t = (jax.random.normal(k_wq, (n_head * d_k, d_model)) * std_qk).T
    wk_t = (jax.random.normal(k_wk, (n_head * d_k, d_model)) * std_qk).T
    wv_t = (jax.random.normal(k_wv, (n_head * d_v, d_model)) * std_v).T
    gamma = jnp.ones((d_model,), jnp.float32)    # LayerNorm weight
    beta = jnp.zeros((d_model,), jnp.float32)    # LayerNorm bias

    # Fast path: no attention-probability output (the new default).
    out = multi_head_attention(q, k, v, wq_t, wk_t, wv_t, gamma, beta,
                               n_head=n_head, d_k=d_k, d_v=d_v)
    jax.block_until_ready(out)

    # Debug path: also return the (B, n_head, Lq, Lk) probabilities.
    out2, attn = multi_head_attention(q, k, v, wq_t, wk_t, wv_t, gamma, beta,
                                      n_head=n_head, d_k=d_k, d_v=d_v,
                                      return_attn=True,
                                      attn_dtype=jnp.float32)
    jax.block_until_ready((out2, attn))

    # Pure-JAX reference check.
    def ref(q, k, v):
        qp = (q @ wq_t).reshape(B, L, n_head, d_k).transpose(0, 2, 1, 3)
        kp = (k @ wk_t).reshape(B, L, n_head, d_k).transpose(0, 2, 1, 3)
        vp = (v @ wv_t).reshape(B, L, n_head, d_v).transpose(0, 2, 1, 3)
        scores = jnp.einsum("bhqd,bhkd->bhqk", qp / (d_k ** 0.5), kp)
        a = jax.nn.softmax(scores, axis=-1)
        o = jnp.einsum("bhqk,bhkd->bhqd", a, vp)
        o = o.transpose(0, 2, 1, 3).reshape(B, L, n_head * d_v) + q
        mu = o.mean(-1, keepdims=True)
        var = ((o - mu) ** 2).mean(-1, keepdims=True)
        return (o - mu) / jnp.sqrt(var + 1e-5) * gamma + beta, a

    out_ref_, attn_ref_ = ref(q, k, v)
    # Output tolerance covers the EUP approximate reciprocal that normalizes
    # the per-head context; the returned attention uses an exact divide.
    assert jnp.allclose(out, out_ref_, atol=2e-2, rtol=2e-2)
    assert jnp.allclose(out2, out_ref_, atol=2e-2, rtol=2e-2)
    assert jnp.allclose(attn, attn_ref_, atol=1e-3, rtol=1e-3)
    print("KERNEL_OK")
</pallas_src>

<mosaic_0001>
module attributes {stable_mosaic.version = 11 : i64} {
  func.func @_mha_kernel(%arg0: i32, %arg1: i32, %arg2: memref<1x8x32xf32, #tpu.memory_space<vmem>>, %arg3: memref<1x8x32xf32, #tpu.memory_space<vmem>>, %arg4: memref<1x8x32xf32, #tpu.memory_space<vmem>>, %arg5: memref<32x32xf32, #tpu.memory_space<vmem>>, %arg6: memref<32x32xf32, #tpu.memory_space<vmem>>, %arg7: memref<32x32xf32, #tpu.memory_space<vmem>>, %arg8: memref<1x32xf32, #tpu.memory_space<vmem>>, %arg9: memref<1x32xf32, #tpu.memory_space<vmem>>, %arg10: memref<1x8x32xf32, #tpu.memory_space<vmem>>, %arg11: memref<1x8x32xf32, #tpu.memory_space<vmem>>, %arg12: memref<1x8x32xf32, #tpu.memory_space<vmem>>, %arg13: memref<1x8x32xf32, #tpu.memory_space<vmem>>, %arg14: memref<1x8x32xf32, #tpu.memory_space<vmem>>) attributes {dimension_semantics = [#tpu.dimension_semantics<parallel>, #tpu.dimension_semantics<parallel>], iteration_bounds = array<i64: 2, 1>, scalar_prefetch = 0 : i64, scratch_operands = 4 : i64, tpu.core_type = #tpu.core_type<tc>, window_params = [{transform_indices = @transform_0, window_bounds = array<i64: 1, 8, 32>}, {transform_indices = @transform_1, window_bounds = array<i64: 1, 8, 32>}, {transform_indices = @transform_2, window_bounds = array<i64: 1, 8, 32>}, {pipeline_mode = #tpu.pipeline_mode<synchronous>, transform_indices = @transform_3, window_bounds = array<i64: 32, 32>}, {pipeline_mode = #tpu.pipeline_mode<synchronous>, transform_indices = @transform_4, window_bounds = array<i64: 32, 32>}, {pipeline_mode = #tpu.pipeline_mode<synchronous>, transform_indices = @transform_5, window_bounds = array<i64: 32, 32>}, {pipeline_mode = #tpu.pipeline_mode<synchronous>, transform_indices = @transform_6, window_bounds = array<i64: 1, 32>}, {pipeline_mode = #tpu.pipeline_mode<synchronous>, transform_indices = @transform_7, window_bounds = array<i64: 1, 32>}, {transform_indices = @transform_8, window_bounds = array<i64: 1, 8, 32>}]} {
    %c0 = arith.constant 0 : index
    %c0_0 = arith.constant 0 : index
    %c0_1 = arith.constant 0 : index
    %0 = vector.load %arg2[%c0, %c0_0, %c0_1] : memref<1x8x32xf32, #tpu.memory_space<vmem>>, vector<1x8x32xf32>
    %1 = vector.shape_cast %0 : vector<1x8x32xf32> to vector<8x32xf32>
    %c0_2 = arith.constant 0 : index
    %c0_3 = arith.constant 0 : index
    %c0_4 = arith.constant 0 : index
    %2 = vector.load %arg3[%c0_2, %c0_3, %c0_4] : memref<1x8x32xf32, #tpu.memory_space<vmem>>, vector<1x8x32xf32>
    %3 = vector.shape_cast %2 : vector<1x8x32xf32> to vector<8x32xf32>
    %c0_5 = arith.constant 0 : index
    %c0_6 = arith.constant 0 : index
    %c0_7 = arith.constant 0 : index
    %4 = vector.load %arg4[%c0_5, %c0_6, %c0_7] : memref<1x8x32xf32, #tpu.memory_space<vmem>>, vector<1x8x32xf32>
    %5 = vector.shape_cast %4 : vector<1x8x32xf32> to vector<8x32xf32>
    %c0_8 = arith.constant 0 : index
    %c0_9 = arith.constant 0 : index
    %6 = vector.load %arg5[%c0_8, %c0_9] : memref<32x32xf32, #tpu.memory_space<vmem>>, vector<32x32xf32>
    %cst = arith.constant dense<0.000000e+00> : vector<8x32xf32>
    %7 = tpu.matmul %1, %6, %cst {dimension_numbers = #tpu.dot_dimension_numbers<[1], [0], [0], [1], [0, 0, 1, 1], [], []>} : vector<8x32xf32>, vector<32x32xf32>, vector<8x32xf32> -> vector<8x32xf32>
    %cst_10 = arith.constant 0.353553385 : f32
    %8 = vector.broadcast %cst_10 : f32 to vector<8x32xf32>
    %9 = arith.mulf %7, %8 : vector<8x32xf32>
    %10 = vector.shape_cast %9 : vector<8x32xf32> to vector<1x8x32xf32>
    %c0_11 = arith.constant 0 : index
    %c0_12 = arith.constant 0 : index
    %c0_13 = arith.constant 0 : index
    %11 = vector.load %arg11[%c0_11, %c0_12, %c0_13] : memref<1x8x32xf32, #tpu.memory_space<vmem>>, vector<1x8x32xf32>
    tpu.vector_store %arg11[%c0_11, %c0_12, %c0_13], %10 {strides = array<i32>} : memref<1x8x32xf32, #tpu.memory_space<vmem>>, vector<1x8x32xf32>,
    %c0_14 = arith.constant 0 : index
    %c0_15 = arith.constant 0 : index
    %12 = vector.load %arg6[%c0_14, %c0_15] : memref<32x32xf32, #tpu.memory_space<vmem>>, vector<32x32xf32>
    %cst_16 = arith.constant dense<0.000000e+00> : vector<8x32xf32>
    %13 = tpu.matmul %3, %12, %cst_16 {dimension_numbers = #tpu.dot_dimension_numbers<[1], [0], [0], [1], [0, 0, 1, 1], [], []>} : vector<8x32xf32>, vector<32x32xf32>, vector<8x32xf32> -> vector<8x32xf32>
    %14 = vector.shape_cast %13 : vector<8x32xf32> to vector<1x8x32xf32>
    %c0_17 = arith.constant 0 : index
    %c0_18 = arith.constant 0 : index
    %c0_19 = arith.constant 0 : index
    %15 = vector.load %arg12[%c0_17, %c0_18, %c0_19] : memref<1x8x32xf32, #tpu.memory_space<vmem>>, vector<1x8x32xf32>
    tpu.vector_store %arg12[%c0_17, %c0_18, %c0_19], %14 {strides = array<i32>} : memref<1x8x32xf32, #tpu.memory_space<vmem>>, vector<1x8x32xf32>,
    %c0_20 = arith.constant 0 : index
    %c0_21 = arith.constant 0 : index
    %16 = vector.load %arg7[%c0_20, %c0_21] : memref<32x32xf32, #tpu.memory_space<vmem>>, vector<32x32xf32>
    %cst_22 = arith.constant dense<0.000000e+00> : vector<8x32xf32>
    %17 = tpu.matmul %5, %16, %cst_22 {dimension_numbers = #tpu.dot_dimension_numbers<[1], [0], [0], [1], [0, 0, 1, 1], [], []>} : vector<8x32xf32>, vector<32x32xf32>, vector<8x32xf32> -> vector<8x32xf32>
    %18 = vector.shape_cast %17 : vector<8x32xf32> to vector<1x8x32xf32>
    %c0_23 = arith.constant 0 : index
    %c0_24 = arith.constant 0 : index
    %c0_25 = arith.constant 0 : index
    %19 = vector.load %arg13[%c0_23, %c0_24, %c0_25] : memref<1x8x32xf32, #tpu.memory_space<vmem>>, vector<1x8x32xf32>
    tpu.vector_store %arg13[%c0_23, %c0_24, %c0_25], %18 {strides = array<i32>} : memref<1x8x32xf32, #tpu.memory_space<vmem>>, vector<1x8x32xf32>,
    %c0_26 = arith.constant 0 : index
    %c0_27 = arith.constant 0 : index
    %c0_28 = arith.constant 0 : index
    %20 = vector.load %arg11[%c0_26, %c0_27, %c0_28] : memref<1x8x32xf32, #tpu.memory_space<vmem>>, vector<1x8x8xf32>
    %c0_29 = arith.constant 0 : index
    %c0_30 = arith.constant 0 : index
    %c0_31 = arith.constant 0 : index
    %21 = vector.load %arg12[%c0_29, %c0_30, %c0_31] : memref<1x8x32xf32, #tpu.memory_space<vmem>>, vector<1x8x8xf32>
    %c0_32 = arith.constant 0 : index
    %c0_33 = arith.constant 0 : index
    %c0_34 = arith.constant 0 : index
    %22 = vector.load %arg13[%c0_32, %c0_33, %c0_34] : memref<1x8x32xf32, #tpu.memory_space<vmem>>, vector<1x8x8xf32>
    "tpu.trace_start"() <{level = 10 : i32, message = "bqd,bkd->bqk"}> : () -> ()
    %cst_35 = arith.constant dense<0.000000e+00> : vector<1x8x8xf32>
    %23 = tpu.matmul %20, %21, %cst_35 {dimension_numbers = #tpu.dot_dimension_numbers<[2], [2], [1], [1], [0, 0, 0, 1, 1, 1], [0], [0]>} : vector<1x8x8xf32>, vector<1x8x8xf32>, vector<1x8x8xf32> -> vector<1x8x8xf32>
    "tpu.trace_stop"() : () -> ()
    %cst_36 = arith.constant dense<0xFF800000> : vector<1x8xf32>
    %24 = vector.multi_reduction <maximumf>, %23, %cst_36 [2] : vector<1x8x8xf32> to vector<1x8xf32>
    %25 = vector.shape_cast %24 : vector<1x8xf32> to vector<1x8x1xf32>
    %26 = vector.broadcast %25 : vector<1x8x1xf32> to vector<1x8x8xf32>
    %27 = arith.subf %23, %26 : vector<1x8x8xf32>
    %28 = math.exp %27 : vector<1x8x8xf32>
    %cst_37 = arith.constant dense<0.000000e+00> : vector<1x8xf32>
    %29 = vector.multi_reduction <add>, %28, %cst_37 [2] : vector<1x8x8xf32> to vector<1x8xf32>
    %30 = vector.shape_cast %29 : vector<1x8xf32> to vector<1x8x1xf32>
    "tpu.trace_start"() <{level = 10 : i32, message = "bqk,bkd->bqd"}> : () -> ()
    %cst_38 = arith.constant dense<0.000000e+00> : vector<1x8x8xf32>
    %31 = tpu.matmul %28, %22, %cst_38 {dimension_numbers = #tpu.dot_dimension_numbers<[2], [1], [1], [2], [0, 0, 0, 1, 1, 2], [0], [0]>} : vector<1x8x8xf32>, vector<1x8x8xf32>, vector<1x8x8xf32> -> vector<1x8x8xf32>
    "tpu.trace_stop"() : () -> ()
    %32 = tpu.reciprocal %30 {approx = true} : vector<1x8x1xf32> -> vector<1x8x1xf32>
    %33 = vector.broadcast %32 : vector<1x8x1xf32> to vector<1x8x8xf32>
    %34 = arith.mulf %31, %33 : vector<1x8x8xf32>
    %c0_39 = arith.constant 0 : index
    %c0_40 = arith.constant 0 : index
    %c0_41 = arith.constant 0 : index
    %35 = vector.load %arg14[%c0_39, %c0_40, %c0_41] : memref<1x8x32xf32, #tpu.memory_space<vmem>>, vector<1x8x8xf32>
    tpu.vector_store %arg14[%c0_39, %c0_40, %c0_41], %34 {strides = array<i32>} : memref<1x8x32xf32, #tpu.memory_space<vmem>>, vector<1x8x8xf32>,
    %c0_42 = arith.constant 0 : index
    %c0_43 = arith.constant 0 : index
    %c8 = arith.constant 8 : index
    %36 = vector.load %arg11[%c0_42, %c0_43, %c8] : memref<1x8x32xf32, #tpu.memory_space<vmem>>, vector<1x8x8xf32>
    %c0_44 = arith.constant 0 : index
    %c0_45 = arith.constant 0 : index
    %c8_46 = arith.constant 8 : index
    %37 = vector.load %arg12[%c0_44, %c0_45, %c8_46] : memref<1x8x32xf32, #tpu.memory_space<vmem>>, vector<1x8x8xf32>
    %c0_47 = arith.constant 0 : index
    %c0_48 = arith.constant 0 : index
    %c8_49 = arith.constant 8 : index
    %38 = vector.load %arg13[%c0_47, %c0_48, %c8_49] : memref<1x8x32xf32, #tpu.memory_space<vmem>>, vector<1x8x8xf32>
    "tpu.trace_start"() <{level = 10 : i32, message = "bqd,bkd->bqk"}> : () -> ()
    %cst_50 = arith.constant dense<0.000000e+00> : vector<1x8x8xf32>
    %39 = tpu.matmul %36, %37, %cst_50 {dimension_numbers = #tpu.dot_dimension_numbers<[2], [2], [1], [1], [0, 0, 0, 1, 1, 1], [0], [0]>} : vector<1x8x8xf32>, vector<1x8x8xf32>, vector<1x8x8xf32> -> vector<1x8x8xf32>
    "tpu.trace_stop"() : () -> ()
    %cst_51 = arith.constant dense<0xFF800000> : vector<1x8xf32>
    %40 = vector.multi_reduction <maximumf>, %39, %cst_51 [2] : vector<1x8x8xf32> to vector<1x8xf32>
    %41 = vector.shape_cast %40 : vector<1x8xf32> to vector<1x8x1xf32>
    %42 = vector.broadcast %41 : vector<1x8x1xf32> to vector<1x8x8xf32>
    %43 = arith.subf %39, %42 : vector<1x8x8xf32>
    %44 = math.exp %43 : vector<1x8x8xf32>
    %cst_52 = arith.constant dense<0.000000e+00> : vector<1x8xf32>
    %45 = vector.multi_reduction <add>, %44, %cst_52 [2] : vector<1x8x8xf32> to vector<1x8xf32>
    %46 = vector.shape_cast %45 : vector<1x8xf32> to vector<1x8x1xf32>
    "tpu.trace_start"() <{level = 10 : i32, message = "bqk,bkd->bqd"}> : () -> ()
    %cst_53 = arith.constant dense<0.000000e+00> : vector<1x8x8xf32>
    %47 = tpu.matmul %44, %38, %cst_53 {dimension_numbers = #tpu.dot_dimension_numbers<[2], [1], [1], [2], [0, 0, 0, 1, 1, 2], [0], [0]>} : vector<1x8x8xf32>, vector<1x8x8xf32>, vector<1x8x8xf32> -> vector<1x8x8xf32>
    "tpu.trace_stop"() : () -> ()
    %48 = tpu.reciprocal %46 {approx = true} : vector<1x8x1xf32> -> vector<1x8x1xf32>
    %49 = vector.broadcast %48 : vector<1x8x1xf32> to vector<1x8x8xf32>
    %50 = arith.mulf %47, %49 : vector<1x8x8xf32>
    %c0_54 = arith.constant 0 : index
    %c0_55 = arith.constant 0 : index
    %c8_56 = arith.constant 8 : index
    %51 = vector.load %arg14[%c0_54, %c0_55, %c8_56] : memref<1x8x32xf32, #tpu.memory_space<vmem>>, vector<1x8x8xf32>
    tpu.vector_store %arg14[%c0_54, %c0_55, %c8_56], %50 {strides = array<i32>} : memref<1x8x32xf32, #tpu.memory_space<vmem>>, vector<1x8x8xf32>,
    %c0_57 = arith.constant 0 : index
    %c0_58 = arith.constant 0 : index
    %c16 = arith.constant 16 : index
    %52 = vector.load %arg11[%c0_57, %c0_58, %c16] : memref<1x8x32xf32, #tpu.memory_space<vmem>>, vector<1x8x8xf32>
    %c0_59 = arith.constant 0 : index
    %c0_60 = arith.constant 0 : index
    %c16_61 = arith.constant 16 : index
    %53 = vector.load %arg12[%c0_59, %c0_60, %c16_61] : memref<1x8x32xf32, #tpu.memory_space<vmem>>, vector<1x8x8xf32>
    %c0_62 = arith.constant 0 : index
    %c0_63 = arith.constant 0 : index
    %c16_64 = arith.constant 16 : index
    %54 = vector.load %arg13[%c0_62, %c0_63, %c16_64] : memref<1x8x32xf32, #tpu.memory_space<vmem>>, vector<1x8x8xf32>
    "tpu.trace_start"() <{level = 10 : i32, message = "bqd,bkd->bqk"}> : () -> ()
    %cst_65 = arith.constant dense<0.000000e+00> : vector<1x8x8xf32>
    %55 = tpu.matmul %52, %53, %cst_65 {dimension_numbers = #tpu.dot_dimension_numbers<[2], [2], [1], [1], [0, 0, 0, 1, 1, 1], [0], [0]>} : vector<1x8x8xf32>, vector<1x8x8xf32>, vector<1x8x8xf32> -> vector<1x8x8xf32>
    "tpu.trace_stop"() : () -> ()
    %cst_66 = arith.constant dense<0xFF800000> : vector<1x8xf32>
    %56 = vector.multi_reduction <maximumf>, %55, %cst_66 [2] : vector<1x8x8xf32> to vector<1x8xf32>
    %57 = vector.shape_cast %56 : vector<1x8xf32> to vector<1x8x1xf32>
    %58 = vector.broadcast %57 : vector<1x8x1xf32> to vector<1x8x8xf32>
    %59 = arith.subf %55, %58 : vector<1x8x8xf32>
    %60 = math.exp %59 : vector<1x8x8xf32>
    %cst_67 = arith.constant dense<0.000000e+00> : vector<1x8xf32>
    %61 = vector.multi_reduction <add>, %60, %cst_67 [2] : vector<1x8x8xf32> to vector<1x8xf32>
    %62 = vector.shape_cast %61 : vector<1x8xf32> to vector<1x8x1xf32>
    "tpu.trace_start"() <{level = 10 : i32, message = "bqk,bkd->bqd"}> : () -> ()
    %cst_68 = arith.constant dense<0.000000e+00> : vector<1x8x8xf32>
    %63 = tpu.matmul %60, %54, %cst_68 {dimension_numbers = #tpu.dot_dimension_numbers<[2], [1], [1], [2], [0, 0, 0, 1, 1, 2], [0], [0]>} : vector<1x8x8xf32>, vector<1x8x8xf32>, vector<1x8x8xf32> -> vector<1x8x8xf32>
    "tpu.trace_stop"() : () -> ()
    %64 = tpu.reciprocal %62 {approx = true} : vector<1x8x1xf32> -> vector<1x8x1xf32>
    %65 = vector.broadcast %64 : vector<1x8x1xf32> to vector<1x8x8xf32>
    %66 = arith.mulf %63, %65 : vector<1x8x8xf32>
    %c0_69 = arith.constant 0 : index
    %c0_70 = arith.constant 0 : index
    %c16_71 = arith.constant 16 : index
    %67 = vector.load %arg14[%c0_69, %c0_70, %c16_71] : memref<1x8x32xf32, #tpu.memory_space<vmem>>, vector<1x8x8xf32>
    tpu.vector_store %arg14[%c0_69, %c0_70, %c16_71], %66 {strides = array<i32>} : memref<1x8x32xf32, #tpu.memory_space<vmem>>, vector<1x8x8xf32>,
    %c0_72 = arith.constant 0 : index
    %c0_73 = arith.constant 0 : index
    %c24 = arith.constant 24 : index
    %68 = vector.load %arg11[%c0_72, %c0_73, %c24] : memref<1x8x32xf32, #tpu.memory_space<vmem>>, vector<1x8x8xf32>
    %c0_74 = arith.constant 0 : index
    %c0_75 = arith.constant 0 : index
    %c24_76 = arith.constant 24 : index
    %69 = vector.load %arg12[%c0_74, %c0_75, %c24_76] : memref<1x8x32xf32, #tpu.memory_space<vmem>>, vector<1x8x8xf32>
    %c0_77 = arith.constant 0 : index
    %c0_78 = arith.constant 0 : index
    %c24_79 = arith.constant 24 : index
    %70 = vector.load %arg13[%c0_77, %c0_78, %c24_79] : memref<1x8x32xf32, #tpu.memory_space<vmem>>, vector<1x8x8xf32>
    "tpu.trace_start"() <{level = 10 : i32, message = "bqd,bkd->bqk"}> : () -> ()
    %cst_80 = arith.constant dense<0.000000e+00> : vector<1x8x8xf32>
    %71 = tpu.matmul %68, %69, %cst_80 {dimension_numbers = #tpu.dot_dimension_numbers<[2], [2], [1], [1], [0, 0, 0, 1, 1, 1], [0], [0]>} : vector<1x8x8xf32>, vector<1x8x8xf32>, vector<1x8x8xf32> -> vector<1x8x8xf32>
    "tpu.trace_stop"() : () -> ()
    %cst_81 = arith.constant dense<0xFF800000> : vector<1x8xf32>
    %72 = vector.multi_reduction <maximumf>, %71, %cst_81 [2] : vector<1x8x8xf32> to vector<1x8xf32>
    %73 = vector.shape_cast %72 : vector<1x8xf32> to vector<1x8x1xf32>
    %74 = vector.broadcast %73 : vector<1x8x1xf32> to vector<1x8x8xf32>
    %75 = arith.subf %71, %74 : vector<1x8x8xf32>
    %76 = math.exp %75 : vector<1x8x8xf32>
    %cst_82 = arith.constant dense<0.000000e+00> : vector<1x8xf32>
    %77 = vector.multi_reduction <add>, %76, %cst_82 [2] : vector<1x8x8xf32> to vector<1x8xf32>
    %78 = vector.shape_cast %77 : vector<1x8xf32> to vector<1x8x1xf32>
    "tpu.trace_start"() <{level = 10 : i32, message = "bqk,bkd->bqd"}> : () -> ()
    %cst_83 = arith.constant dense<0.000000e+00> : vector<1x8x8xf32>
    %79 = tpu.matmul %76, %70, %cst_83 {dimension_numbers = #tpu.dot_dimension_numbers<[2], [1], [1], [2], [0, 0, 0, 1, 1, 2], [0], [0]>} : vector<1x8x8xf32>, vector<1x8x8xf32>, vector<1x8x8xf32> -> vector<1x8x8xf32>
    "tpu.trace_stop"() : () -> ()
    %80 = tpu.reciprocal %78 {approx = true} : vector<1x8x1xf32> -> vector<1x8x1xf32>
    %81 = vector.broadcast %80 : vector<1x8x1xf32> to vector<1x8x8xf32>
    %82 = arith.mulf %79, %81 : vector<1x8x8xf32>
    %c0_84 = arith.constant 0 : index
    %c0_85 = arith.constant 0 : index
    %c24_86 = arith.constant 24 : index
    %83 = vector.load %arg14[%c0_84, %c0_85, %c24_86] : memref<1x8x32xf32, #tpu.memory_space<vmem>>, vector<1x8x8xf32>
    tpu.vector_store %arg14[%c0_84, %c0_85, %c24_86], %82 {strides = array<i32>} : memref<1x8x32xf32, #tpu.memory_space<vmem>>, vector<1x8x8xf32>,
    %c0_87 = arith.constant 0 : index
    %c0_88 = arith.constant 0 : index
    %c0_89 = arith.constant 0 : index
    %84 = vector.load %arg14[%c0_87, %c0_88, %c0_89] : memref<1x8x32xf32, #tpu.memory_space<vmem>>, vector<1x8x32xf32>
    %c0_90 = arith.constant 0 : index
    %c0_91 = arith.constant 0 : index
    %c0_92 = arith.constant 0 : index
    %85 = vector.load %arg2[%c0_90, %c0_91, %c0_92] : memref<1x8x32xf32, #tpu.memory_space<vmem>>, vector<1x8x32xf32>
    %86 = arith.addf %84, %85 : vector<1x8x32xf32>
    %cst_93 = arith.constant dense<0.000000e+00> : vector<1x8xf32>
    %87 = vector.multi_reduction <add>, %86, %cst_93 [2] : vector<1x8x32xf32> to vector<1x8xf32>
    %88 = vector.shape_cast %87 : vector<1x8xf32> to vector<1x8x1xf32>
    %cst_94 = arith.constant 3.200000e+01 : f32
    %89 = vector.broadcast %cst_94 : f32 to vector<1x8x1xf32>
    %90 = arith.divf %88, %89 : vector<1x8x1xf32>
    %91 = vector.broadcast %90 : vector<1x8x1xf32> to vector<1x8x32xf32>
    %92 = arith.subf %86, %91 : vector<1x8x32xf32>
    %93 = arith.mulf %92, %92 : vector<1x8x32xf32>
    %cst_95 = arith.constant dense<0.000000e+00> : vector<1x8xf32>
    %94 = vector.multi_reduction <add>, %93, %cst_95 [2] : vector<1x8x32xf32> to vector<1x8xf32>
    %95 = vector.shape_cast %94 : vector<1x8xf32> to vector<1x8x1xf32>
    %cst_96 = arith.constant 3.200000e+01 : f32
    %96 = vector.broadcast %cst_96 : f32 to vector<1x8x1xf32>
    %97 = arith.divf %95, %96 : vector<1x8x1xf32>
    %98 = vector.broadcast %90 : vector<1x8x1xf32> to vector<1x8x32xf32>
    %99 = arith.subf %86, %98 : vector<1x8x32xf32>
    %cst_97 = arith.constant 9.99999974E-6 : f32
    %100 = vector.broadcast %cst_97 : f32 to vector<1x8x1xf32>
    %101 = arith.addf %97, %100 : vector<1x8x1xf32>
    %102 = math.rsqrt %101 : vector<1x8x1xf32>
    %103 = vector.broadcast %102 : vector<1x8x1xf32> to vector<1x8x32xf32>
    %104 = arith.mulf %99, %103 : vector<1x8x32xf32>
    %c0_98 = arith.constant 0 : index
    %c0_99 = arith.constant 0 : index
    %105 = vector.load %arg8[%c0_98, %c0_99] : memref<1x32xf32, #tpu.memory_space<vmem>>, vector<1x32xf32>
    %106 = vector.shape_cast %105 : vector<1x32xf32> to vector<32xf32>
    %107 = vector.shape_cast %106 : vector<32xf32> to vector<1x1x32xf32>
    %108 = vector.broadcast %107 : vector<1x1x32xf32> to vector<1x8x32xf32>
    %109 = arith.mulf %104, %108 : vector<1x8x32xf32>
    %c0_100 = arith.constant 0 : index
    %c0_101 = arith.constant 0 : index
    %110 = vector.load %arg9[%c0_100, %c0_101] : memref<1x32xf32, #tpu.memory_space<vmem>>, vector<1x32xf32>
    %111 = vector.shape_cast %110 : vector<1x32xf32> to vector<32xf32>
    %112 = vector.shape_cast %111 : vector<32xf32> to vector<1x1x32xf32>
    %113 = vector.broadcast %112 : vector<1x1x32xf32> to vector<1x8x32xf32>
    %114 = arith.addf %109, %113 : vector<1x8x32xf32>
    %c0_102 = arith.constant 0 : index
    %c0_103 = arith.constant 0 : index
    %c0_104 = arith.constant 0 : index
    %115 = vector.load %arg10[%c0_102, %c0_103, %c0_104] : memref<1x8x32xf32, #tpu.memory_space<vmem>>, vector<1x8x32xf32>
    tpu.vector_store %arg10[%c0_102, %c0_103, %c0_104], %114 {strides = array<i32>} : memref<1x8x32xf32, #tpu.memory_space<vmem>>, vector<1x8x32xf32>,
    return
  }
  func.func @transform_0(%arg0: i32, %arg1: i32) -> (i32, i32, i32) {
    %c0_i32 = arith.constant 0 : i32
    %c0_i32_0 = arith.constant 0 : i32
    return %arg0, %arg1, %c0_i32 : i32, i32, i32
  }
  func.func @transform_1(%arg0: i32, %arg1: i32) -> (i32, i32, i32) {
    %c0_i32 = arith.constant 0 : i32
    %c0_i32_0 = arith.constant 0 : i32
    %c0_i32_1 = arith.constant 0 : i32
    return %arg0, %c0_i32, %c0_i32_0 : i32, i32, i32
  }
  func.func @transform_2(%arg0: i32, %arg1: i32) -> (i32, i32, i32) {
    %c0_i32 = arith.constant 0 : i32
    %c0_i32_0 = arith.constant 0 : i32
    %c0_i32_1 = arith.constant 0 : i32
    return %arg0, %c0_i32, %c0_i32_0 : i32, i32, i32
  }
  func.func @transform_3(%arg0: i32, %arg1: i32) -> (i32, i32) {
    %c0_i32 = arith.constant 0 : i32
    %c0_i32_0 = arith.constant 0 : i32
    %c0_i32_1 = arith.constant 0 : i32
    return %c0_i32, %c0_i32_0 : i32, i32
  }
  func.func @transform_4(%arg0: i32, %arg1: i32) -> (i32, i32) {
    %c0_i32 = arith.constant 0 : i32
    %c0_i32_0 = arith.constant 0 : i32
    %c0_i32_1 = arith.constant 0 : i32
    return %c0_i32, %c0_i32_0 : i32, i32
  }
  func.func @transform_5(%arg0: i32, %arg1: i32) -> (i32, i32) {
    %c0_i32 = arith.constant 0 : i32
    %c0_i32_0 = arith.constant 0 : i32
    %c0_i32_1 = arith.constant 0 : i32
    return %c0_i32, %c0_i32_0 : i32, i32
  }
  func.func @transform_6(%arg0: i32, %arg1: i32) -> (i32, i32) {
    %c0_i32 = arith.constant 0 : i32
    %c0_i32_0 = arith.constant 0 : i32
    %c0_i32_1 = arith.constant 0 : i32
    return %c0_i32, %c0_i32_0 : i32, i32
  }
  func.func @transform_7(%arg0: i32, %arg1: i32) -> (i32, i32) {
    %c0_i32 = arith.constant 0 : i32
    %c0_i32_0 = arith.constant 0 : i32
    %c0_i32_1 = arith.constant 0 : i32
    return %c0_i32, %c0_i32_0 : i32, i32
  }
  func.func @transform_8(%arg0: i32, %arg1: i32) -> (i32, i32, i32) {
    %c0_i32 = arith.constant 0 : i32
    %c0_i32_0 = arith.constant 0 : i32
    return %arg0, %arg1, %c0_i32 : i32, i32, i32
  }
}

</mosaic_0001>

<bundles_post_ra>
// kernel: tpu_custom_call.1
= control target key start
LH: loop header
LB: loop body
LE: loop exit
PB: predicated region body
PF: predicated region fallthrough
CT: control target
= control target key end

     0   :  { %s1838_s0 = inlined_call_operand.hbm [shape: f32[2,8,32], index: 0, kind: input, shape index: {}]   ;;  %s1839_s1 = inlined_call_operand.hbm [shape: f32[2,8,32], index: 1, kind: input, shape index: {}]   ;;  %s1840_s2 = inlined_call_operand.hbm [shape: f32[2,8,32], index: 2, kind: input, shape index: {}]   ;;  %s1841_s3 = inlined_call_operand.hbm [shape: f32[32,32], index: 3, kind: input, shape index: {}]   ;;  %s1842_s4 = inlined_call_operand.hbm [shape: f32[32,32], index: 4, kind: input, shape index: {}]   ;;  %s1843_s5 = inlined_call_operand.hbm [shape: f32[32,32], index: 5, kind: input, shape index: {}]   ;;  %s1844_s6 = inlined_call_operand.vmem [shape: f32[1,32], index: 6, kind: input, shape index: {}]   ;;  %s1845_s7 = inlined_call_operand.vmem [shape: f32[1,32], index: 7, kind: input, shape index: {}]   ;;  %s1846_s8 = inlined_call_operand.hbm [shape: f32[2,8,32], index: 8, kind: output, shape index: {}]  }
   0x1   :  { %1860 = sst [smem:[#allocation30_spill]] %s1839_s1 }
   0x2   :  { %1861 = sst [smem:[#allocation31_spill]] %s1841_s3 }
   0x3   :  { %1862 = sst [smem:[#allocation32_spill]] %s1842_s4 }
   0x4   :  { %1863 = sst [smem:[#allocation33_spill]] %s1843_s5 }
   0x5   :  { %1864 = sst [smem:[#allocation34_spill]] %s1845_s7 }
   0x6   :  { %13 = vsyncpa [#allocation7], 0 }
   0x7   :  { %15 = vsyncpa [#allocation7 + $0x1], 0 }
   0x8   :  { %16 = vsyncpa [#allocation10], 0 }
   0x9   :  { %18 = vsyncpa [#allocation10 + $0x1], 0 }
   0xa   :  { %19 = vsyncpa [#allocation13], 0 }
   0xb   :  { %20 = vsyncpa [#allocation16], 0 }
   0xc   :  { %21 = vsyncpa [#allocation8], 0 }
   0xd   :  { %23 = vsyncpa [#allocation8 + $0x1], 0  ;;  %s1569_s27 = smov 0   ;;  %s1571_s28 = smov 0  }
   0xe   :  { %s1573_s29 = smov 0   ;;  %s1575_s30 = smov 0  }
   0xf   :  { %s1577_s9 = smov 0   ;;  %s1579_s10 = smov 0  }
  0x10 LB: > { %1865 = sst [smem:[#allocation23_spill]] %s1490_s27  ;;  %s1600_s11 = sadd.s32 4294967295, %s1510_s10   ;;  %s1510_s10 = sphi %s1579_s10, %s29_s10   ;;  %s1506_s9 = sphi %s1577_s9, %s1893_s9   ;;  %s1502_s30 = sphi %s1575_s30, %s1892_s30   ;;  %s1498_s29 = sphi %s1573_s29, %s1896_s29   ;;  %s1494_s28 = sphi %s1571_s28, %s1895_s28   ;;  %s1490_s27 = sphi %s1569_s27, %s1894_s27  }
  0x11   : > { %1866 = sst [smem:[#allocation24_spill]] %s1506_s9  ;;  %p1064_p0 = scmp.ge.s32.totalorder %s1510_s10, 1 }
  0x12   : > { %1867 = sst [smem:[#allocation25_spill]] %s1510_s10  ;;  %p64_p1 = scmp.eq.s32.totalorder %s1600_s11, 0 }
  0x13   : > { %p259_p2 = scmp.lt.s32.totalorder %s1510_s10, 3  ;;  %s1868_s3 = sld [smem:[#allocation31_spill]] }
  0x14   : > { %s1512_s16 = smov [#allocation12]   ;;  %p1068_p6 = scmp.ge.s32.totalorder %s1510_s10, 2 }
  0x15   : > { %p1608_p3 = pnand %p1064_p0, %p259_p2  ;;  %s272_s17 = sshll.u32 %s1512_s16, 4  ;;  %s273_s17 = int_to_ptr.vmem [resolvable:$true] %s272_s17 }
  0x16   : > { %s1847_s19 = smov 128   ;;  %s1849_s20 = smov 8  }
  0x17   : > { %p1122_p4 = pneg %p1608_p3  ;;  %s1063_s21 = sadd.s32 4294967294, %s1510_s10  }
  0x18   : > { %s41_s22 = sadd.s32 1, %s1506_s9  ;;  %s50_s23 = sadd.s32 1, %s1498_s29 }
  0x19   : > { %s270_s14 = sshll.u32 %s1868_s3, 4  ;;  %p1616_p5 = pnand %p1122_p4, %p64_p1  ;;  %s271_s14 = int_to_ptr.hbm [resolvable:$true] %s270_s14 }
  0x1a   : > { %p43_p7 = scmp.ge.s32.totalorder %s41_s22, 2  ;;  %p57_p8 = scmp.ne.s32.totalorder %s1498_s29, %s1494_s28 }
  0x1b   : > { %1125 = dma.hbm_to_vmem [thread:$0]  (!%p1616_p5), %s271_s14, 512, %s273_s17, [#allocation13], %s1847_s19, %s1847_s19, %s1849_s20  }
  0x1c   : > { %p58_p9 = scmp.eq.s32.totalorder %s1510_s10, 0  ;;  %p63_p10 = scmp.ne.s32.totalorder %s1494_s28, %s1490_s27 }
  0x1d   : > { %s1898_s22 = smov (%p43_p7, %s41_s22), 0  ;;  %p246_p13 = scmp.eq.s32.totalorder %s1600_s11, 1 }
  0x1e   : > { %1871 = sst [smem:[#allocation26_spill]] %s1898_s22  ;;  %p1636_p11 = por %p58_p9, %p57_p8 }
  0x1f   : > { %p1642_p12 = por %p64_p1, %p63_p10  ;;  %s45_s26 = ssub.s32 %s1506_s9, %s1898_s22 }
  0x20   : > { %p48_p0 = scmp.eq.s32.totalorder %s45_s26, 0  ;;  %p252_p2 = scmp.eq.s32.totalorder %s1063_s21, 1 }
  0x21   : > { %p1649_p4 = por %p246_p13, %p57_p8  ;;  %p1149_p7 = scmp.lt.s32.totalorder %s1510_s10, 2 }
  0x22   : > { %s1655_s13 = scalar_select %p48_p0, %s1498_s29, %s50_s23  }
  0x23   : > { %s1874_s12 = scalar_select %p1649_p4, 1, 0 }
  0x24   : > { %1876 = sst [smem:[#allocation28_spill]] %s1655_s13  ;;  %p1657_p9 = por %p252_p2, %p63_p10 }
  0x25   : > { %1875 = sst [smem:[#allocation27_spill]] %s1874_s12  ;;  %s1852_s16 = sand.u32 1, %s1498_s29  }
  0x26   : > { %s1877_s14 = scalar_select %p1657_p9, 1, 0 }
  0x27   : > { %s1664_s17 = sshll.u32 %s1852_s16, 3  ;;  %s1667_s19 = sshll.u32 %s1506_s9, 3 }
  0x28   : > { %1878 = sst [smem:[#allocation29_spill]] %s1877_s14  ;;  %p1671_p8 = pnand %p1149_p7, %p1636_p11 }
  0x29   : > { %s340_s23 = sand.u32 1, %s1510_s10   ;;  %s1880_s1 = sld [smem:[#allocation30_spill]] }
  0x2a   : > { %s344_s13 = scalar_lea.vmem [#allocation9], %s1664_s17  ;;  %s1681_s24 = scalar_lea.sflag [#allocation10], %s340_s23 }
  0x2b   : > { %s352_s16 = sshll.u32 %s344_s13, 4  ;;  %s1881_s4 = sld [smem:[#allocation32_spill]]  ;;  %s353_s16 = int_to_ptr.vmem [resolvable:$true] %s352_s16 }
  0x2c   : > { %s1515_s20 = smov [#allocation14]   ;;  %s1882_s5 = sld [smem:[#allocation33_spill]] }
  0x2d   : > { %s1883_s23 = smov 8   ;;  %s1884_s27 = smov 128  }
  0x2e   : > { %s1516_s9 = smov [#allocation15]   ;;  %s324_s13 = scalar_lea.vmem [#allocation6], %s1664_s17 }
  0x2f   : > { %s348_s3 = scalar_lea.hbm %s1880_s1, %s1667_s19  ;;  %s333_s26 = sshll.u32 %s324_s13, 4  ;;  %s334_s26 = int_to_ptr.vmem [resolvable:$true] %s333_s26 }
  0x30   : > { %s350_s22 = sshll.u32 %s348_s3, 4  ;;  %s286_s3 = sshll.u32 %s1515_s20, 4  ;;  %s351_s22 = int_to_ptr.hbm [resolvable:$true] %s350_s22  ;;  %s287_s3 = int_to_ptr.vmem [resolvable:$true] %s286_s3 }
  0x31   : > { %1138 = dma.hbm_to_vmem [thread:$0]  (!%p1671_p8), %s351_s22, 128, %s353_s16, %s1681_s24  }
  0x32   : > { %s284_s10 = sshll.u32 %s1881_s4, 4  ;;  %s298_s1 = sshll.u32 %s1882_s5, 4  ;;  %s285_s10 = int_to_ptr.hbm [resolvable:$true] %s284_s10  ;;  %s299_s1 = int_to_ptr.hbm [resolvable:$true] %s298_s1 }
  0x33   : > { %1128 = dma.hbm_to_vmem [thread:$0]  (!%p1616_p5), %s285_s10, 512, %s287_s3, [#allocation13], %s1884_s27, %s1884_s27, %s1883_s23  }
  0x34   : > { %s300_s22 = sshll.u32 %s1516_s9, 4  ;;  %s329_s20 = scalar_lea.hbm %s1838_s0, %s1667_s19  ;;  %s301_s22 = int_to_ptr.vmem [resolvable:$true] %s300_s22 }
  0x35   : > { %1131 = dma.hbm_to_vmem [thread:$0]  (!%p1616_p5), %s299_s1, 512, %s301_s22, [#allocation16], %s1884_s27, %s1884_s27, %s1883_s23  }
  0x36   : > { %s331_s4 = sshll.u32 %s329_s20, 4  ;;  %s1885_s10 = sand.u32 1, %s1498_s29   ;;  %s332_s4 = int_to_ptr.hbm [resolvable:$true] %s331_s4 }
  0x37   : > { %s321_s3 = scalar_lea.sflag [#allocation7], %s1885_s10  ;;  %s367_s5 = scalar_lea.hbm %s1840_s2, %s1667_s19 }
  0x38   : > { %1135 = dma.hbm_to_vmem [thread:$0]  (!%p1671_p8), %s332_s4, 128, %s334_s26, %s321_s3  }
  0x39   : > { %s363_s7 = scalar_lea.vmem [#allocation11], %s1664_s17  ;;  %s369_s1 = sshll.u32 %s367_s5, 4  ;;  %s370_s1 = int_to_ptr.hbm [resolvable:$true] %s369_s1 }
  0x3a   : > { %s371_s12 = sshll.u32 %s363_s7, 4  ;;  %380 = sbr.rel (%p1608_p3) target bundleno = 1136 (0x470), region = 52  ;;  %s372_s12 = int_to_ptr.vmem [resolvable:$true] %s371_s12 }
  0x3b   : > { %1141 = dma.hbm_to_vmem [thread:$0]  (!%p1671_p8), %s370_s1, 128, %s372_s12, %s1681_s24  }
  0x3c   : > { %s1722_s27 = sand.u32 (!%p1608_p3), 1, %s1494_s28  }
  0x3d   : > { %s1725_s4 = sshll.u32 (!%p1608_p3), %s1722_s27, 3  ;;  %s383_s19 = scalar_lea.sflag (!%p1608_p3), [#allocation7], %s1722_s27 }
  0x3e   : > { %s386_s17 = scalar_lea.vmem (!%p1608_p3), [#allocation6], %s1725_s4 }
  0x3f   : > { %1469 = dma.done.wait (%p1642_p12), %s383_s19, 128  }
  0x40   : > { %1471 = vsyncadd (%p1642_p12), %s383_s19, 4294967168  ;;  %s392_s5 = sand.u32 1, %s1600_s11   ;;  %s396_s15 = scalar_lea.vmem [#allocation9], %s1725_s4 }
  0x41   : > { %s393_s7 = scalar_lea.sflag [#allocation10], %s392_s5 }
  0x42   : > { %1473 = dma.done.wait (%p1642_p12), %s393_s7, 256  }
  0x43   : > { %1475 = vsyncadd (%p1642_p12), %s393_s7, 4294967040  ;;  %s406_s12 = scalar_lea.vmem [#allocation11], %s1725_s4 }
  0x44   : > { %1477 = dma.done.wait (%p64_p1), [#allocation13], 1024  }
  0x45   : > { %1479 = vsyncadd (%p64_p1), [#allocation13], 4294966272 }
  0x46   : > { %1481 = dma.done.wait (%p64_p1), [#allocation16], 512  }
  0x47   : > { %1483 = vsyncadd (%p64_p1), [#allocation16], 4294966784  ;;  %v501_v0 = vld [vmem:[#allocation14 + $0x18] sm:$0xff]  ;;  %v500_v2 = vld [vmem:[#allocation14 + $0x10] sm:$0xff]  ;;  %vm472_vm0 = vcmask 261120   ;;  %vm557_vm1 = vcmask 64512  }
  0x48   : > { %v471_v1 = vld [vmem:[#allocation12 + $0x18] sm:$0xff]  ;;  %517 = vmatpush.msra.mxu1 %v501_v0  ;;  %v470_v3 = vld [vmem:[#allocation12 + $0x10] sm:$0xff]  ;;  %v499_v4 = vld [vmem:[#allocation14 + $0x8] sm:$0xff]  ;;  %s1517_s11 = smov 104   ;;  %s1518_s25 = smov 112   ;;  %vm694_vm2 = vcmask 130112  }
  0x49   : > { %488 = vmatpush.msra.mxu0 %v471_v1  ;;  %v469_v5 = vld [vmem:[#allocation12 + $0x8] sm:$0xff]  ;;  %v498_v6 = vld [vmem:[#allocation14] sm:$0xff]  ;;  %v1748_v9 = vld [vmem:[%s386_s17] sm:$0xff]  ;;  %s1519_s21 = smov 120   ;;  %s1520_s24 = smov 8   ;;  %vm771_vm3 = vcmask 195712  }
  0x4a   : > { %518 = vmatpush.msra.mxu1 %v500_v2  ;;  %v468_v7 = vld [vmem:[#allocation12] sm:$0xff]  ;;  %v529_v15 = vld [vmem:[#allocation15 + $0x18] sm:$0xff]  ;;  %v528_v16 = vld [vmem:[#allocation15 + $0x10] sm:$0xff]  ;;  %s1521_s23 = smov 24   ;;  %s1522_s22 = smov 16   ;;  %vm848_vm4 = vcmask 261312  }
  0x4b   : > { %489 = vmatpush.msra.mxu0 %v470_v3  ;;  %v466_v8 = vld [vmem:[%s396_s15] sm:$0xff]  ;;  %545 = vmatpush.msra.mxu2 %v529_v15  ;;  %v467_v19 = vld [vmem:[%s406_s12] sm:$0xff]  ;;  %s1099_s14 = sshll.u32 %s1502_s30, 3  ;;  %s1887_s1 = sld [smem:[#allocation34_spill]] }
  0x4c   : > { %519 = vmatpush.msra.mxu1 %v499_v4  ;;  %v527_v17 = vld [vmem:[#allocation15 + $0x8] sm:$0xff]  ;;  %v526_v18 = vld [vmem:[#allocation15] sm:$0xff]  ;;  %s905_s10 = scalar_lea.hbm %s1846_s8, %s1099_s14  ;;  %s464_s30 = scalar_lea.vmem [#allocation17], %s1725_s4 }
  0x4d   : > { %490 = vmatpush.msra.mxu0 %v469_v5  ;;  %546 = vmatpush.msra.mxu2 %v528_v16  ;;  %s907_s19 = sshll.u32 %s464_s30, 4  ;;  %s909_s17 = sshll.u32 %s905_s10, 4  ;;  %s908_s19 = int_to_ptr.vmem [resolvable:$true] %s907_s19  ;;  %s910_s17 = int_to_ptr.hbm [resolvable:$true] %s909_s17 }
  0x4e   : > { %520 = vmatpush.msra.mxu1 %v498_v6  ;;  %s894_s5 = scalar_lea.sflag [#allocation8], %s1722_s27  ;;  %s1430_s7 = sshra.s32 %s910_s17, 4  ;;  %s1431_s7 = int_to_ptr.hbm [resolvable:$true] %s1430_s7 }
  0x4f   : > { %491 = vmatpush.msra.mxu0 %v468_v7  ;;  %1084 = vmatmul.msk.f32.vlgmr.msra.gmra.mxu1 %vm472_vm0, %v466_v8  ;;  %s1432_s15 = scalar_lea.hbm %s1431_s7, 8  ;;  %s1436_s4 = scalar_lea.hbm %s1846_s8, 16 }
  0x50   : > { %1083 = vmatmul.msk.f32.vlgmr.msra.gmra.mxu0 %vm472_vm0, %v1748_v9  ;;  %547 = vmatpush.msra.mxu2 %v527_v17  ;;  %p1433_p1 = scmp.ne.s32.totalorder %s1431_s7, %s1432_s15  ;;  %p1437_p10 = scmp.lt.s32.totalorder %s1431_s7, %s1846_s8 }
  0x51   : > { %p1438_p11 = scmp.lt.s32.totalorder %s1436_s4, %s1432_s15 }
  0x52   : > { %548 = vmatpush.msra.mxu2 %v526_v18  ;;  %v1523_v18 = vmov 32.0   ;;  %p1434_p3 = pnand %p1433_p1, %p1649_p4 }
  0x53   : > { %1085 = vmatmul.msk.f32.vlgmr.msra.gmra.mxu2 %vm472_vm0, %v467_v19  ;;  %p1439_p12 = por %p1438_p11, %p1437_p10 }
  0x54   : > { %p1435_p5 = pneg %p1434_p3 }
  0x56   : > { %p1440_p13 = pnand %p1439_p12, %p1435_p5 }
  0xcc   : > { %v522_v10 = vpop.f32.mrf.mxu1 }
  0xcd   : > { %v493_v11 = vpop.f32.mrf.mxu0  ;;  %525 = vst.msk [vmem:[#allocation3] sm:$0xff] %vm472_vm0, %v522_v10 }
  0xce   : > { %v496_v12 = vmul.f32 0.35355338, %v493_v11 }
  0xd0   : > { %497 = vst.msk [vmem:[#allocation2] sm:$0xff] %vm472_vm0, %v496_v12 }
  0xd4   : > { %v774_v13 = vld [vmem:[#allocation3] sm:$0xff] }
  0xd5   : > { %780 = vrot.lane.b32.xlu2 %v774_v13, %s1517_s11  ;;  %703 = vrot.lane.b32.xlu0 %v774_v13, %s1518_s25 }
  0xd6   : > { %626 = vrot.lane.b32.xlu1 %v774_v13, %s1519_s21  ;;  %1086 = vmatpush.xpose.msk.msra.mxu3 %vm557_vm1, %v774_v13  ;;  %v550_v28 = vpop.f32.mrf.mxu2 }
  0xd7   : > { %v554_v14 = vld [vmem:[#allocation2] sm:$0xff]  ;;  %553 = vst.msk [vmem:[#allocation4] sm:$0xff] %vm472_vm0, %v550_v28 }
  0xd9   : > { %1087 = vmatmul.msk.f32.vlgmr.msra.gmra.mxu3 %vm557_vm1, %v554_v14 }
  0xdd   : > { %777 = vrot.lane.b32.xlu2 %v554_v14, %s1517_s11  ;;  %700 = vrot.lane.b32.xlu0 %v554_v14, %s1518_s25 }
  0xde   : > { %623 = vrot.lane.b32.xlu1 %v554_v14, %s1519_s21  ;;  %v621_v29 = vld [vmem:[#allocation4] sm:$0xff] }
  0xdf   : > { %611 = vmatpush.msrb.mxu3 %v621_v29 }
 0x12f   : > { %v781_v22 = vpop.permute.xlu2 %780 }
 0x137   : > { %v778_v25 = vpop.permute.xlu2 %777 }
 0x147   : > { %v704_v20 = vpop.permute.xlu0 %703 }
 0x148   : > { %v627_v21 = vpop.permute.xlu1 %626  ;;  %1092 = vmatpush.xpose.msk.msrb.mxu2 %vm557_vm1, %v704_v20 }
 0x149   : > { %1089 = vmatpush.xpose.msk.msrb.mxu0 %vm557_vm1, %v627_v21 }
 0x14d   : > { %1095 = vmatpush.xpose.msk.msra.mxu0 %vm557_vm1, %v781_v22 }
 0x14f   : > { %v701_v23 = vpop.permute.xlu0 %700 }
 0x150   : > { %v624_v24 = vpop.permute.xlu1 %623  ;;  %1093 = vmatmul.msk.f32.vlgmr.msrb.gmra.mxu2 %vm557_vm1, %v701_v23 }
 0x151   : > { %1090 = vmatmul.msk.f32.vlgmr.msrb.gmra.mxu0 %vm557_vm1, %v624_v24 }
 0x159   : > { %1096 = vmatmul.msk.f32.vlgmr.msra.gmra.mxu0 %vm557_vm1, %v778_v25 }
 0x15c   : > { %v581_v26 = vpop.f32.mrf.mxu3 }
 0x15d   : > { %v584_v27 = vsel %vm557_vm1, %v581_v26, -inf }
 0x15e   : > { %585 = vmax.xlane.f32.xlu0 %v584_v27 }
 0x172   : > { %662 = vrot.lane.b32.xlu0 %v621_v29, %s1519_s21 }
 0x1ce   : > { %v649_v30 = vpop.f32.mrf.mxu0 }
 0x1cf   : > { %v652_v31 = vsel %vm557_vm1, %v649_v30, -inf }
 0x1d0   : > { %653 = vmax.xlane.f32.xlu1 %v652_v31 }
 0x1d1   : > { %v586_v32 = vpop.xlane.xlu0 %585 }
 0x1d2   : > { %v587_v33 = vsub.f32 %v581_v26, %v586_v32 }
 0x1d3   : > { %v726_v34 = vpop.f32.mrf.mxu2 }
 0x1d4   : > { %v588_v35 = vmul.f32 1.442695, %v587_v33  ;;  %v729_v36 = vsel %vm557_vm1, %v726_v34, -inf }
 0x1d5   : > { %730 = vmax.xlane.f32.xlu2 %v729_v36 }
 0x1d6   : > { %1216 = vpow2.f32 %v588_v35  ;;  %v803_v37 = vpop.f32.mrf.mxu0 }
 0x1d7   : > { %v806_v39 = vsel %vm557_vm1, %v803_v37, -inf }
 0x1dc   : > { %v1217_v38 = vpop.eup %1216 }
 0x1dd   : > { %1088 = vmatmul.msk.f32.vlgmr.msrb.gmra.mxu3 %vm557_vm1, %v1217_v38  ;;  %807 = vmax.xlane.f32.xlu2 %v806_v39  ;;  %v590_v54 = vsel %vm557_vm1, %v1217_v38, 0.0  ;;  %v1214_v38 = vld [vmem:[%s1844_s6] ss:$0 sm:$0xff] }
 0x1e4   : > { %v663_v40 = vpop.permute.xlu0 %662 }
 0x1e5   : > { %683 = vmatpush.msrb.mxu1 %v663_v40 }
 0x1e9   : > { %739 = vrot.lane.b32.xlu1 %v621_v29, %s1518_s25 }
 0x1f5   : > { %816 = vrot.lane.b32.xlu2 %v621_v29, %s1517_s11 }
 0x243   : > { %v654_v41 = vpop.xlane.xlu1 %653 }
 0x244   : > { %v655_v42 = vsub.f32 %v649_v30, %v654_v41  ;;  %v1215_v41 = vld [vmem:[%s1887_s1] ss:$0 sm:$0xff] }
 0x246   : > { %v656_v43 = vmul.f32 1.442695, %v655_v42 }
 0x248   : > { %1218 = vpow2.f32 %v656_v43  ;;  %v731_v44 = vpop.xlane.xlu2 %730 }
 0x249   : > { %v732_v45 = vsub.f32 %v726_v34, %v731_v44 }
 0x24b   : > { %v733_v46 = vmul.f32 1.442695, %v732_v45 }
 0x24d   : > { %1220 = vpow2.f32 %v733_v46 }
 0x24e   : > { %v1219_v47 = vpop.eup %1218 }
 0x24f   : > { %1091 = vmatmul.msk.f32.vlgmr.msrb.gmra.mxu1 %vm557_vm1, %v1219_v47  ;;  %v658_v48 = vsel %vm557_vm1, %v1219_v47, 0.0 }
 0x250   : > { %659 = vadd.xlane.f32.xlu0 %v658_v48  ;;  %v808_v49 = vpop.xlane.xlu2 %807 }
 0x251   : > { %v809_v50 = vsub.f32 %v803_v37, %v808_v49 }
 0x253   : > { %v1221_v51 = vpop.eup %1220  ;;  %v810_v52 = vmul.f32 1.442695, %v809_v50 }
 0x254   : > { %v735_v53 = vsel %vm557_vm1, %v1221_v51, 0.0 }
 0x255   : > { %1222 = vpow2.f32 %v810_v52  ;;  %736 = vadd.xlane.f32.xlu1 %v735_v53 }
 0x258   : > { %591 = vadd.xlane.f32.xlu0 %v590_v54  ;;  %v817_v55 = vpop.permute.xlu2 %816 }
 0x259   : > { %837 = vmatpush.msra.mxu1 %v817_v55 }
 0x25b   : > { %v1223_v56 = vpop.eup %1222  ;;  %v740_v57 = vpop.permute.xlu1 %739 }
 0x25c   : > { %760 = vmatpush.msra.mxu3 %v740_v57  ;;  %1097 = vmatmul.msk.f32.vlgmr.msra.gmra.mxu1 %vm557_vm1, %v1223_v56  ;;  %v812_v58 = vsel %vm557_vm1, %v1223_v56, 0.0 }
 0x25d   : > { %1094 = vmatmul.msk.f32.vlgmr.msra.gmra.mxu3 %vm557_vm1, %v1221_v51  ;;  %813 = vadd.xlane.f32.xlu2 %v812_v58 }
 0x260   : > { %v613_v2 = vpop.f32.mrf.mxu3 }
 0x2c3   : > { %v660_v59 = vpop.xlane.xlu0 %659 }
 0x2c4   : > { %1224 = vrcp.f32 %v660_v59 }
 0x2c8   : > { %v737_v4 = vpop.xlane.xlu1 %736 }
 0x2ca   : > { %v1225_v61 = vpop.eup %1224 }
 0x2cb   : > { %v592_v60 = vpop.xlane.xlu0 %591 }
 0x2cc   : > { %1226 = vrcp.f32 %v592_v60  ;;  %v685_v62 = vpop.f32.mrf.mxu1 }
 0x2cd   : > { %v689_v63 = vmul.f32 %v1225_v61, %v685_v62 }
 0x2cf   : > { %691 = vrot.lane.b32.xlu1 %v689_v63, %s1520_s24 }
 0x2d0   : > { %v814_v0 = vpop.xlane.xlu2 %813 }
 0x2d1   : > { %1228 = vrcp.f32 %v814_v0 }
 0x2d2   : > { %v1227_v1 = vpop.eup %1226  ;;  %1230 = vrcp.f32 %v737_v4 }
 0x2d3   : > { %v617_v3 = vmul.f32 %v1227_v1, %v613_v2  ;;  %1232 = vrcp.f32 %v1523_v18 }
 0x2d5   : > { %618 = vst.msk [vmem:[#allocation5] sm:$0xff] %vm557_vm1, %v617_v3 }
 0x2d7   : > { %v1229_v5 = vpop.eup %1228 }
 0x2d8   : > { %v1231_v8 = vpop.eup %1230 }
 0x2d9   : > { %v839_v6 = vpop.f32.mrf.mxu1  ;;  %v1233_v19 = vpop.eup %1232 }
 0x2da   : > { %v843_v7 = vmul.f32 %v1229_v5, %v839_v6  ;;  %v857_v20 = vmul.f32 32.0, %v1233_v19  ;;  %vm861_vm5 = vweird.f32 %v1233_v19 }
 0x2dc   : > { %845 = vrot.lane.b32.xlu2 %v843_v7, %s1521_s23  ;;  %v858_v21 = vsub.f32 1.0, %v857_v20 }
 0x2de   : > { %v859_v22 = vmul.f32 %v1233_v19, %v858_v21 }
 0x2e0   : > { %v762_v10 = vpop.f32.mrf.mxu3  ;;  %v860_v23 = vadd.f32 %v1233_v19, %v859_v22 }
 0x2e1   : > { %v766_v11 = vmul.f32 %v1231_v8, %v762_v10 }
 0x2e2   : > { %v862_v24 = vsel %vm861_vm5, %v1233_v19, %v860_v23 }
 0x2e3   : > { %768 = vrot.lane.b32.xlu0 %v766_v11, %s1522_s22 }
 0x336   : > { %v846_v14 = vpop.permute.xlu2 %845 }
 0x341   : > { %v692_v12 = vpop.permute.xlu1 %691 }
 0x342   : > { %695 = vst.msk [vmem:[#allocation5] sm:$0xff] %vm694_vm2, %v692_v12 }
 0x355   : > { %v769_v13 = vpop.permute.xlu0 %768 }
 0x356   : > { %772 = vst.msk [vmem:[#allocation5] sm:$0xff] %vm771_vm3, %v769_v13 }
 0x357   : > { %849 = vst.msk [vmem:[#allocation5] sm:$0xff] %vm848_vm4, %v846_v14 }
 0x35e   : > { %v850_v15 = vld [vmem:[#allocation5] sm:$0xff] }
 0x35f   : > { %v852_v16 = vadd.f32 %v850_v15, %v1748_v9 }
 0x361   : > { %v853_v17 = vsel %vm472_vm0, %v852_v16, 0.0 }
 0x362   : > { %854 = vadd.xlane.f32.xlu0 %v853_v17 }
 0x3d5   : > { %v855_v25 = vpop.xlane.xlu0 %854 }
 0x3d6   : > { %v863_v26 = vmul.f32 %v862_v24, %v855_v25 }
 0x3d8   : > { %v864_v27 = vsub.f32 %v852_v16, %v863_v26 }
 0x3da   : > { %v865_v28 = vmul.f32 %v864_v27, %v864_v27 }
 0x3dc   : > { %v866_v29 = vsel %vm472_vm0, %v865_v28, 0.0 }
 0x3dd   : > { %867 = vadd.xlane.f32.xlu1 %v866_v29 }
 0x450   : > { %v868_v9 = vpop.xlane.xlu1 %867 }
 0x451   : > { %v869_v30 = vmul.f32 %v868_v9, %v862_v24 }
 0x453   : > { %v870_v31 = vadd.f32 1e-05, %v869_v30 }
 0x455   : > { %1234 = vrsqrt.f32 %v870_v31  ;;  %vm877_vm7 = vweird.f32 %v870_v31 }
 0x45b   : > { %v1235_v32 = vpop.eup %1234 }
 0x45c   : > { %v872_v33 = vmul.f32 %v1235_v32, %v870_v31  ;;  %vm878_vm6 = vweird.f32 %v1235_v32 }
 0x45d   : > { %vm879_vm8 = vmor %vm877_vm7, %vm878_vm6 }
 0x45e   : > { %v873_v34 = vmul.f32 %v1235_v32, %v872_v33 }
 0x460   : > { %v874_v35 = vmul.f32 0.5, %v873_v34 }
 0x462   : > { %v875_v36 = vsub.f32 1.5, %v874_v35 }
 0x464   : > { %v876_v37 = vmul.f32 %v1235_v32, %v875_v36 }
 0x466   : > { %v880_v39 = vsel %vm879_vm8, %v1235_v32, %v876_v37 }
 0x467   : > { %v881_v40 = vmul.f32 %v880_v39, %v864_v27 }
 0x469   : > { %v886_v42 = vmul.f32 %v1214_v38, %v881_v40 }
 0x46b   : > { %v891_v43 = vadd.f32 %v1215_v41, %v886_v42 }
 0x46d   : > { %892 = vst.msk [vmem:[%s464_s30] sm:$0xff] %vm472_vm0, %v891_v43 }
 0x46e   : > { %1443 = shalt.err (!%p1440_p13)
}
 0x46f   : > { %1120 = dma.vmem_to_hbm [thread:$0]  (%p1649_p4), %s908_s19, 128, %s910_s17, %s894_s5  }
 0x470 PF: > { %s1888_s27 = sld [smem:[#allocation23_spill]]  ;;  %p1143_p0 = pnand %p1068_p6, %p1657_p9 }
 0x471   : > { %s1890_s23 = sld [smem:[#allocation25_spill]] }
 0x472   : > { %p1144_p2 = pneg %p1143_p0 }
 0x476   : > { %s921_s22 = sand.u32 1, %s1888_s27  }
 0x477   : > { %s922_s14 = scalar_lea.sflag [#allocation8], %s921_s22 }
 0x478   : > { %1485 = dma.done.wait (%p1144_p2), %s922_s14, 128  }
 0x479   : > { %1487 = vsyncadd (%p1144_p2), %s922_s14, 4294967168  ;;  %s29_s10 = sadd.s32 1, %s1890_s23   ;;  %s1891_s16 = sld [smem:[#allocation28_spill]] }
 0x47a   : > { %p26_p7 = scmp.ge.s32.totalorder %s29_s10, 4   ;;  %s1892_s30 = sld [smem:[#allocation24_spill]] }
 0x47b   : > { %s1893_s9 = sld [smem:[#allocation26_spill]]  ;;  %s1894_s27 = smov %s1494_s28 }
 0x47c   : > { %s1895_s28 = smov %s1498_s29  ;;  %28 = sbr.rel (!%p26_p7) target bundleno = 16 (0x10), region = 133 }
 0x47f   : > { %s1896_s29 = smov %s1891_s16 }
 0x481   :  { %928 = vsyncpa [#allocation7], 1 }
 0x482   :  { %930 = vsyncpa [#allocation7 + $0x1], 1 }
 0x483   :  { %931 = vsyncpa [#allocation10], 1 }
 0x484   :  { %933 = vsyncpa [#allocation10 + $0x1], 1 }
 0x485   :  { %934 = vsyncpa [#allocation13], 1 }
 0x486   :  { %935 = vsyncpa [#allocation16], 1 }
 0x487   :  { %936 = vsyncpa [#allocation8], 1 }
 0x488   :  { %938 = vsyncpa [#allocation8 + $0x1], 1 }

</bundles_post_ra>
